<compile_context>
chip_gen: v5e
topology: v5e:2x2
jax: 0.10.0
libtpu: 0.0.40
codegen_flags: <defaults>
</compile_context>

<pallas_src>
import jax
import jax.numpy as jnp
from jax.experimental import pallas as pl
from jax.experimental.pallas import tpu as pltpu


def _homoscedastic_kernel(packed_ref, out_ref):
    # packed_ref: (2, N) f32 in VMEM. Row 0 = losses, row 1 = params.
    packed = packed_ref[...]
    losses = packed[0:1, :]                       # (1, N)
    params = packed[1:2, :]                       # (1, N)

    norm = params * params                        # params ** 2
    # 0.5 / norm * losses + log(1 + norm); reciprocal + log1p run on the EUP.
    term = 0.5 * losses * pl.reciprocal(norm, approx=False) + jnp.log1p(norm)

    # Full reduction to a scalar; written to the SMEM scalar output.
    out_ref[0, 0] = jnp.sum(term)


def homoscedastic_loss_weighted_sum(losses_vec, params):
    """losses_vec, params: (N,) arrays. Returns scalar f32."""
    n = losses_vec.shape[0]
    assert params.shape[0] == n

    # Single packed operand -> single input DMA, no padding, no masking.
    packed = jnp.stack(
        [losses_vec.astype(jnp.float32), params.astype(jnp.float32)], axis=0
    )  # (2, N)

    out = pl.pallas_call(
        _homoscedastic_kernel,
        out_shape=jax.ShapeDtypeStruct((1, 1), jnp.float32),
        in_specs=[pl.BlockSpec((2, n), lambda: (0, 0))],          # full-array block
        out_specs=pl.BlockSpec(memory_space=pltpu.SMEM),          # scalar in SMEM
    )(packed)
    return out.reshape(())


class HomoscedasticLossWeightedSumPallas:
    """Mirrors the PyTorch module: params initialized to ones(num_losses)."""

    def __init__(self, num_losses):
        self.num_losses = num_losses
        self.params = jnp.ones((num_losses,), jnp.float32)  # deterministic init

    def __call__(self, *losses):
        # One stack over the per-task scalar losses (no per-scalar asarray ops).
        losses_vec = jnp.stack(losses).astype(jnp.float32)
        return homoscedastic_loss_weighted_sum(losses_vec, self.params)


if __name__ == "__main__":
    num_losses = 4
    key = jax.random.PRNGKey(0)
    # Deterministic example per-task scalar losses.
    loss_values = jax.random.uniform(
        key, (num_losses,), dtype=jnp.float32, minval=0.1, maxval=2.0)

    module = HomoscedasticLossWeightedSumPallas(num_losses)
    out = module(*[loss_values[i] for i in range(num_losses)])
    out = jax.block_until_ready(out)

    # Reference check in plain JAX.
    norm = module.params ** 2
    ref = jnp.sum(0.5 / norm * loss_values + jnp.log1p(norm))
    assert jnp.allclose(out, ref, rtol=1e-5, atol=1e-5), (out, ref)

    print("KERNEL_OK")
</pallas_src>

<mosaic_0001>
module attributes {stable_mosaic.version = 11 : i64} {
  func.func @_homoscedastic_kernel(%arg0: memref<2x4xf32, #tpu.memory_space<vmem>>, %arg1: memref<1x1xf32, #tpu.memory_space<smem>>) attributes {dimension_semantics = [], scalar_prefetch = 0 : i64, scratch_operands = 0 : i64, tpu.core_type = #tpu.core_type<tc>} {
    %c0 = arith.constant 0 : index
    %c0_0 = arith.constant 0 : index
    %0 = vector.load %arg0[%c0, %c0_0] : memref<2x4xf32, #tpu.memory_space<vmem>>, vector<2x4xf32>
    %1 = vector.extract_strided_slice %0 {offsets = [0, 0], sizes = [1, 4], strides = [1, 1]} : vector<2x4xf32> to vector<1x4xf32>
    %2 = vector.extract_strided_slice %0 {offsets = [1, 0], sizes = [1, 4], strides = [1, 1]} : vector<2x4xf32> to vector<1x4xf32>
    %3 = arith.mulf %2, %2 : vector<1x4xf32>
    %cst = arith.constant 5.000000e-01 : f32
    %4 = vector.broadcast %cst : f32 to vector<1x4xf32>
    %5 = arith.mulf %4, %1 : vector<1x4xf32>
    %6 = tpu.reciprocal %3 : vector<1x4xf32> -> vector<1x4xf32>
    %7 = arith.mulf %5, %6 : vector<1x4xf32>
    %8 = math.log1p %3 : vector<1x4xf32>
    %9 = arith.addf %7, %8 : vector<1x4xf32>
    %10 = vector.shape_cast %9 : vector<1x4xf32> to vector<1x1x4xf32>
    %cst_1 = arith.constant dense<0.000000e+00> : vector<1xf32>
    %11 = vector.multi_reduction <add>, %10, %cst_1 [1, 2] : vector<1x1x4xf32> to vector<1xf32>
    %12 = vector.shape_cast %11 : vector<1xf32> to vector<1x1x1xf32>
    %13 = vector.extract %12[0, 0, 0] : f32 from vector<1x1x1xf32>
    %c0_2 = arith.constant 0 : index
    %c0_3 = arith.constant 0 : index
    %14 = memref.load %arg1[%c0_2, %c0_3] : memref<1x1xf32, #tpu.memory_space<smem>>
    memref.store %13, %arg1[%c0_2, %c0_3] : memref<1x1xf32, #tpu.memory_space<smem>>
    return
  }
}

</mosaic_0001>

<bundles_post_ra>
// kernel: tpu_custom_call.1
= control target key start
LH: loop header
LB: loop body
LE: loop exit
PB: predicated region body
PF: predicated region fallthrough
CT: control target
= control target key end

     0   :  { %6 = vsyncpa [#allocation3], 0  ;;  %s152_s0 = inlined_call_operand.hbm [shape: f32[2,4], index: 0, kind: input, shape index: {}]   ;;  %s153_s1 = inlined_call_operand.hbm [shape: f32[1,1], index: 1, kind: output, shape index: {}]  }
   0x1   :  { %7 = vsyncpa [#allocation4], 0  ;;  %s13_s8 = sshll.u32 %s152_s0, 4  ;;  %s134_s9 = smov [#allocation2]   ;;  %s14_s8 = int_to_ptr.hbm [resolvable:$true] %s13_s8 }
   0x2   :  { %s15_s10 = sshll.u32 %s134_s9, 4  ;;  %s16_s10 = int_to_ptr.vmem [resolvable:$true] %s15_s10 }
   0x3   :  { %18 = dma.hbm_to_vmem [thread:$0]  %s14_s8, 32, %s16_s10, [#allocation3]  }
   0x4   :  { %130 = dma.done.wait [#allocation3], 32  }
   0x5   :  { %131 = vsyncadd [#allocation3], 4294967264  ;;  %v23_v0 = vld [vmem:[#allocation2] sm:$0x3]  ;;  %vm57_vm5 = vcmask 24576   ;;  %s75_s12 = sshll.u32 %s153_s1, 4  ;;  %s76_s12 = int_to_ptr.hbm [resolvable:$true] %s75_s12 }
   0x6   :  { %v24_v1 = vmul.f32 %v23_v0, %v23_v0  ;;  %v25_v17 = vmul.f32 0.5, %v23_v0  ;;  %s135_s14 = smov [#allocation5]  }
   0x8   :  { %90 = vrcp.f32 %v24_v1  ;;  %v44_v2 = vadd.f32 1.0, %v24_v1  ;;  %v47_v3 = vmul.f32 -0.5, %v24_v1  ;;  %v37_v7 = vand.u32 2147483648, %v24_v1 }
   0x9   :  { %vm31_vm0 = vweird.f32 %v24_v1  ;;  %v35_v10 = vand.u32 2147483647, %v24_v1 }
   0xa   :  { %92 = vlog2.f32 %v44_v2  ;;  %v48_v5 = vadd.f32 1.0, %v47_v3  ;;  %v38_v14 = vor.u32 1.1754944e-38, %v37_v7 }
   0xb   :  { %vm51_vm2 = vcmp.lt.f32.partialorder %v35_v10, 0.0004427343  ;;  %vm36_vm4 = vcmp.eq.f32.partialorder %v35_v10, 8.507059e+37 }
   0xc   :  { %v49_v12 = vmul.f32 %v48_v5, %v24_v1 }
   0xe   :  { %v91_v4 = vpop.eup %90 }
   0xf   :  { %v27_v6 = vmul.f32 %v91_v4, %v24_v1  ;;  %vm32_vm1 = vweird.f32 %v91_v4 }
  0x10   :  { %v93_v8 = vpop.eup %92  ;;  %vm33_vm3 = vmor %vm31_vm0, %vm32_vm1 }
  0x11   :  { %v28_v9 = vsub.f32 1.0, %v27_v6  ;;  %v46_v11 = vmul.f32 0.6931472, %v93_v8 }
  0x13   :  { %v29_v13 = vmul.f32 %v91_v4, %v28_v9  ;;  %v52_v16 = vsel %vm51_vm2, %v49_v12, %v46_v11 }
  0x14   :  { %v54_v21 = vrot.slane %v52_v16, 1 }
  0x15   :  { %v30_v15 = vadd.f32 %v91_v4, %v29_v13 }
  0x17   :  { %v34_v18 = vsel %vm33_vm3, %v91_v4, %v30_v15 }
  0x18   :  { %v39_v19 = vsel %vm36_vm4, %v38_v14, %v34_v18 }
  0x19   :  { %v41_v20 = vrot.slane %v39_v19, 1 }
  0x1b   :  { %v43_v22 = vmul.f32 %v41_v20, %v25_v17 }
  0x1d   :  { %v56_v23 = vadd.f32 %v54_v21, %v43_v22 }
  0x1f   :  { %v58_v24 = vsel %vm57_vm5, %v56_v23, 0.0 }
  0x20   :  { %59 = vadd.xlane.f32.xlu0 %v58_v24 }
  0x93   :  { %v60_v25 = vpop.xlane.xlu0 %59 }
  0x94   :  { %v61_v26 = vrot.slane %v60_v25, 4 }
  0x96   :  { %v62_v27 = vadd.f32 %v61_v26, %v60_v25 }
  0x98   :  { %v63_v28 = vrot.slane %v62_v27, 2 }
  0x9a   :  { %v64_v29 = vadd.f32 %v63_v28, %v62_v27 }
  0x9c   :  { %v65_v30 = vrot.slane %v64_v29, 1 }
  0x9e   :  { %v66_v31 = vadd.f32 %v65_v30, %v64_v29 }
  0xa0   :  { %86 = vpush %v66_v31 }
  0xd1   :  { %s87_s13 = spop %86 }
  0xd2   :  { %69 = sst [smem:[#allocation5]] %s87_s13 }
  0xd3   :  { %78 = dma.smem_to_hbm %s135_s14, 16, %s76_s12, [#allocation4]  }
  0xd4   :  { %132 = dma.done.wait [#allocation4], 16  }
  0xd5   :  { %133 = vsyncadd [#allocation4], 4294967280 }
  0xd6   :  { %83 = sfence }
  0xd7   :  { %84 = vsyncpa [#allocation3], 1 }
  0xd8   :  { %85 = vsyncpa [#allocation4], 1 }

</bundles_post_ra>
